<compile_context>
chip_gen: v7x
topology: tpu7x:2x2x1
jax: 0.10.0
libtpu: 0.0.40
codegen_flags: <defaults>
</compile_context>

<pallas_src>
import jax
import jax.numpy as jnp
from jax.experimental import pallas as pl
from jax.experimental.pallas import tpu as pltpu

B = 2             # batch
C, H, W = 4, 16, 16
F_IN = C * H * W  # 1024 flattened features
HIDDEN = 32       # per-head hidden width
NUM_CLASSES = 16

HID_CAT = 3 * HIDDEN   # 96 concatenated hidden columns
HID_PAD = 128          # lane-dense hidden width (bf16 -> padding is cheap)
OUT_PAD = 128          # lane-dense output width (unmasked vst)


# --------------------------------------------------------------------------- #
# Kernel
# --------------------------------------------------------------------------- #
def ensemble_kernel(x_ref, w1_ref, b1_ref, w2_ref, b2_ref, o_ref):
    """Fused ensemble: relu(x @ W1_cat + b1_cat) @ W2_stack + b2_sum.

    x arrives as f32 (no extra HBM cast pass) and is cast to bf16 in-VMEM;
    weights are bf16; both dots accumulate in f32 on the MXU.
    """
    x = x_ref[...].astype(jnp.bfloat16)                                   # [TB, F_IN]
    h = jnp.dot(x, w1_ref[...], preferred_element_type=jnp.float32)       # [TB, 128] f32
    h = jnp.maximum(h + b1_ref[...], 0.0)
    y = jnp.dot(h.astype(jnp.bfloat16), w2_ref[...],
                preferred_element_type=jnp.float32)                       # [TB, 128] f32
    o_ref[...] = y + b2_ref[...]


# --------------------------------------------------------------------------- #
# One-time weight preparation (hoisted out of the per-call path)
# --------------------------------------------------------------------------- #
def fuse_and_pad_params(params):
    """Fold the 3 heads into two lane-dense padded matmuls; cast weights to bf16."""
    w1_cat = jnp.concatenate([p[0] for p in params], axis=1)            # [F_IN, 96]
    b1_cat = jnp.concatenate([p[1] for p in params], axis=0)            # [96]
    w2_stk = jnp.concatenate([p[2] for p in params], axis=0) / 3.0      # [96, 16]
    b2_sum = (params[0][3] + params[1][3] + params[2][3]) / 3.0         # [16]

    w1_p = (jnp.zeros((F_IN, HID_PAD), jnp.bfloat16)
            .at[:, :HID_CAT].set(w1_cat.astype(jnp.bfloat16)))
    b1_p = jnp.zeros((1, HID_PAD), jnp.float32).at[:, :HID_CAT].set(b1_cat)
    w2_p = (jnp.zeros((HID_PAD, OUT_PAD), jnp.bfloat16)
            .at[:HID_CAT, :NUM_CLASSES].set(w2_stk.astype(jnp.bfloat16)))
    b2_p = jnp.zeros((1, OUT_PAD), jnp.float32).at[:, :NUM_CLASSES].set(b2_sum)
    return (w1_p, b1_p, w2_p, b2_p)


# --------------------------------------------------------------------------- #
# Batch tiling plan
# --------------------------------------------------------------------------- #
def _round_up(n, m):
    return ((n + m - 1) // m) * m


def _batch_plan(b):
    """Return (tile_b, b_run).

    Tiny batches: pad to a single 16-row tile (one small copy, fully aligned).
    Larger batches: no zero-pad (ragged last block is handled by Pallas; the
    garbage rows are row-independent and sliced off), tiles up to 512 rows to
    amortize the ~0.35 us per-step overhead, and always >= 2 grid steps so the
    'parallel' batch axis shards across both TensorCores on v7x.
    """
    if b <= 32:
        tile_b = _round_up(max(b, 8), 16)
        return tile_b, tile_b
    tile_b = min(512, _round_up(_round_up(b, 16) // 2, 16))
    return tile_b, b


# --------------------------------------------------------------------------- #
# Forward pass (jitted; weights are prepared once and just passed through)
# --------------------------------------------------------------------------- #
@jax.jit
def _ensemble_forward(x_nchw, w1_p, b1_p, w2_p, b2_p):
    b = x_nchw.shape[0]
    x2d = x_nchw.reshape(b, -1)                      # [B, F_IN] glue reshape

    tile_b, b_run = _batch_plan(b)
    if b_run != b:                                   # tiny-batch path only
        x2d = jnp.zeros((b_run, F_IN), x2d.dtype).at[:b, :].set(x2d)

    grid = (pl.cdiv(b_run, tile_b),)
    out_p = pl.pallas_call(
        ensemble_kernel,
        out_shape=jax.ShapeDtypeStruct((b_run, OUT_PAD), jnp.float32),
        grid=grid,
        in_specs=[
            pl.BlockSpec((tile_b, F_IN), lambda i: (i, 0)),     # x: tiled over batch
            pl.BlockSpec((F_IN, HID_PAD), lambda i: (0, 0)),    # weights: VMEM-resident
            pl.BlockSpec((1, HID_PAD), lambda i: (0, 0)),
            pl.BlockSpec((HID_PAD, OUT_PAD), lambda i: (0, 0)),
            pl.BlockSpec((1, OUT_PAD), lambda i: (0, 0)),
        ],
        out_specs=pl.BlockSpec((tile_b, OUT_PAD), lambda i: (i, 0)),
        compiler_params=pltpu.CompilerParams(
            dimension_semantics=("parallel",)),                  # megacore on v7x
    )(x2d, w1_p, b1_p, w2_p, b2_p)

    return out_p[:b, :NUM_CLASSES]


class TinyAudioNetEnsemble:
    """Ensemble wrapper: weight fusion/padding/casting happens ONCE here."""

    def __init__(self, params):
        self.fused = jax.block_until_ready(fuse_and_pad_params(params))

    def __call__(self, x_nchw):
        return _ensemble_forward(x_nchw, *self.fused)


# --------------------------------------------------------------------------- #
# Deterministic params + f32 reference
# --------------------------------------------------------------------------- #
def make_params():
    """Deterministic PyTorch-Linear-style (uniform) init for three sub-models."""
    key = jax.random.PRNGKey(0)
    params = []
    for _ in range(3):
        k1, k2, k3, k4, key = jax.random.split(key, 5)
        lim1 = 1.0 / (F_IN ** 0.5)
        lim2 = 1.0 / (HIDDEN ** 0.5)
        w1 = jax.random.uniform(k1, (F_IN, HIDDEN), jnp.float32, -lim1, lim1)
        b1 = jax.random.uniform(k2, (HIDDEN,), jnp.float32, -lim1, lim1)
        w2 = jax.random.uniform(k3, (HIDDEN, NUM_CLASSES), jnp.float32, -lim2, lim2)
        b2 = jax.random.uniform(k4, (NUM_CLASSES,), jnp.float32, -lim2, lim2)
        params.append((w1, b1, w2, b2))
    return params


def reference(x_nchw, params):
    """Pure-JAX f32 reference (un-fused, per-head)."""
    x2d = x_nchw.reshape(x_nchw.shape[0], -1)
    outs = []
    for (w1, b1, w2, b2) in params:
        h = jnp.maximum(x2d @ w1 + b1, 0.0)
        outs.append(h @ w2 + b2)
    return (outs[0] + outs[1] + outs[2]) / 3.0


if __name__ == "__main__":
    key_x = jax.random.PRNGKey(0)
    x = jax.random.normal(key_x, (B, C, H, W), dtype=jnp.float32)
    params = make_params()

    model = TinyAudioNetEnsemble(params)      # one-time fuse/pad/bf16 cast
    out = model(x)
    out = jax.block_until_ready(out)

    ref = reference(x, params)                # f32 reference; bf16 kernel tolerance
    assert out.shape == (B, NUM_CLASSES)
    assert jnp.allclose(out, ref, atol=3e-2, rtol=3e-2), "mismatch vs reference"
    print("KERNEL_OK")
</pallas_src>

<mosaic_0001>
module attributes {stable_mosaic.version = 11 : i64} {
  func.func @ensemble_kernel(%arg0: i32, %arg1: memref<16x1024xf32, #tpu.memory_space<vmem>>, %arg2: memref<1024x128xbf16, #tpu.memory_space<vmem>>, %arg3: memref<1x128xf32, #tpu.memory_space<vmem>>, %arg4: memref<128x128xbf16, #tpu.memory_space<vmem>>, %arg5: memref<1x128xf32, #tpu.memory_space<vmem>>, %arg6: memref<16x128xf32, #tpu.memory_space<vmem>>) attributes {dimension_semantics = [#tpu.dimension_semantics<parallel>], iteration_bounds = array<i64: 1>, scalar_prefetch = 0 : i64, scratch_operands = 0 : i64, tpu.core_type = #tpu.core_type<tc>, window_params = [{transform_indices = @transform_0, window_bounds = array<i64: 16, 1024>}, {pipeline_mode = #tpu.pipeline_mode<synchronous>, transform_indices = @transform_1, window_bounds = array<i64: 1024, 128>}, {pipeline_mode = #tpu.pipeline_mode<synchronous>, transform_indices = @transform_2, window_bounds = array<i64: 1, 128>}, {pipeline_mode = #tpu.pipeline_mode<synchronous>, transform_indices = @transform_3, window_bounds = array<i64: 128, 128>}, {pipeline_mode = #tpu.pipeline_mode<synchronous>, transform_indices = @transform_4, window_bounds = array<i64: 1, 128>}, {transform_indices = @transform_5, window_bounds = array<i64: 16, 128>}]} {
    %c0 = arith.constant 0 : index
    %c0_0 = arith.constant 0 : index
    %0 = vector.load %arg1[%c0, %c0_0] : memref<16x1024xf32, #tpu.memory_space<vmem>>, vector<16x1024xf32>
    %1 = arith.truncf %0 : vector<16x1024xf32> to vector<16x1024xbf16>
    %c0_1 = arith.constant 0 : index
    %c0_2 = arith.constant 0 : index
    %2 = vector.load %arg2[%c0_1, %c0_2] : memref<1024x128xbf16, #tpu.memory_space<vmem>>, vector<1024x128xbf16>
    %cst = arith.constant dense<0.000000e+00> : vector<16x128xf32>
    %3 = tpu.matmul %1, %2, %cst {dimension_numbers = #tpu.dot_dimension_numbers<[1], [0], [0], [1], [0, 0, 1, 1], [], []>} : vector<16x1024xbf16>, vector<1024x128xbf16>, vector<16x128xf32> -> vector<16x128xf32>
    %c0_3 = arith.constant 0 : index
    %c0_4 = arith.constant 0 : index
    %4 = vector.load %arg3[%c0_3, %c0_4] : memref<1x128xf32, #tpu.memory_space<vmem>>, vector<1x128xf32>
    %5 = vector.broadcast %4 : vector<1x128xf32> to vector<16x128xf32>
    %6 = arith.addf %3, %5 : vector<16x128xf32>
    %cst_5 = arith.constant 0.000000e+00 : f32
    %7 = vector.broadcast %cst_5 : f32 to vector<16x128xf32>
    %8 = arith.maximumf %6, %7 : vector<16x128xf32>
    %9 = arith.truncf %8 : vector<16x128xf32> to vector<16x128xbf16>
    %c0_6 = arith.constant 0 : index
    %c0_7 = arith.constant 0 : index
    %10 = vector.load %arg4[%c0_6, %c0_7] : memref<128x128xbf16, #tpu.memory_space<vmem>>, vector<128x128xbf16>
    %cst_8 = arith.constant dense<0.000000e+00> : vector<16x128xf32>
    %11 = tpu.matmul %9, %10, %cst_8 {dimension_numbers = #tpu.dot_dimension_numbers<[1], [0], [0], [1], [0, 0, 1, 1], [], []>} : vector<16x128xbf16>, vector<128x128xbf16>, vector<16x128xf32> -> vector<16x128xf32>
    %c0_9 = arith.constant 0 : index
    %c0_10 = arith.constant 0 : index
    %12 = vector.load %arg5[%c0_9, %c0_10] : memref<1x128xf32, #tpu.memory_space<vmem>>, vector<1x128xf32>
    %13 = vector.broadcast %12 : vector<1x128xf32> to vector<16x128xf32>
    %14 = arith.addf %11, %13 : vector<16x128xf32>
    %c0_11 = arith.constant 0 : index
    %c0_12 = arith.constant 0 : index
    %15 = vector.load %arg6[%c0_11, %c0_12] : memref<16x128xf32, #tpu.memory_space<vmem>>, vector<16x128xf32>
    tpu.vector_store %arg6[%c0_11, %c0_12], %14 {strides = array<i32>} : memref<16x128xf32, #tpu.memory_space<vmem>>, vector<16x128xf32>,
    return
  }
  func.func @transform_0(%arg0: i32) -> (i32, i32) {
    %c0_i32 = arith.constant 0 : i32
    %c0_i32_0 = arith.constant 0 : i32
    return %arg0, %c0_i32 : i32, i32
  }
  func.func @transform_1(%arg0: i32) -> (i32, i32) {
    %c0_i32 = arith.constant 0 : i32
    %c0_i32_0 = arith.constant 0 : i32
    %c0_i32_1 = arith.constant 0 : i32
    return %c0_i32, %c0_i32_0 : i32, i32
  }
  func.func @transform_2(%arg0: i32) -> (i32, i32) {
    %c0_i32 = arith.constant 0 : i32
    %c0_i32_0 = arith.constant 0 : i32
    %c0_i32_1 = arith.constant 0 : i32
    return %c0_i32, %c0_i32_0 : i32, i32
  }
  func.func @transform_3(%arg0: i32) -> (i32, i32) {
    %c0_i32 = arith.constant 0 : i32
    %c0_i32_0 = arith.constant 0 : i32
    %c0_i32_1 = arith.constant 0 : i32
    return %c0_i32, %c0_i32_0 : i32, i32
  }
  func.func @transform_4(%arg0: i32) -> (i32, i32) {
    %c0_i32 = arith.constant 0 : i32
    %c0_i32_0 = arith.constant 0 : i32
    %c0_i32_1 = arith.constant 0 : i32
    return %c0_i32, %c0_i32_0 : i32, i32
  }
  func.func @transform_5(%arg0: i32) -> (i32, i32) {
    %c0_i32 = arith.constant 0 : i32
    %c0_i32_0 = arith.constant 0 : i32
    return %arg0, %c0_i32 : i32, i32
  }
}

</mosaic_0001>

<bundles_post_ra>
// kernel: _ensemble_forward.1
= control target key start
LH: loop header
LB: loop body
LE: loop exit
PB: predicated region body
PF: predicated region fallthrough
CT: control target
= control target key end

     0   :  { %10 = vsyncpa [#allocation3], 0  ;;  %s1156_s18 = smov [#allocation2]   ;;  %s1287_s0 = inlined_call_operand.vmem [shape: f32[16,1024], index: 0, kind: input, shape index: {}]   ;;  %s1288_s1 = inlined_call_operand.hbm [shape: bf16[1024,128], index: 1, kind: input, shape index: {}]   ;;  %s1289_s2 = inlined_call_operand.vmem [shape: f32[1,128], index: 2, kind: input, shape index: {}]   ;;  %s1290_s3 = inlined_call_operand.vmem [shape: bf16[128,128], index: 3, kind: input, shape index: {}]   ;;  %s1291_s4 = inlined_call_operand.vmem [shape: f32[1,128], index: 4, kind: input, shape index: {}]   ;;  %s1292_s5 = inlined_call_operand.vmem [shape: f32[16,128], index: 5, kind: output, shape index: {}]  }
   0x1   :  { %s18_s19 = sshll.u32 %s1156_s18, 4  ;;  %s1132_s22 = scalar_lea.hbm %s1288_s1, 8192  ;;  %s19_s19 = int_to_ptr.vmem [resolvable:$true] %s18_s19 }
   0x2   :  { %p1133_p0 = scmp.ne.s32.totalorder %s1288_s1, %s1132_s22  ;;  %p1136_p1 = scmp.lt.u32.totalorder %s1132_s22, %s1288_s1 }
   0x4   :  { %p1138_p2 = pnand %p1136_p1, %p1133_p0 }
   0x6   :  { %1141 = shalt.err (!%p1138_p2)
}
   0x7   :  { %s1142_s27 = scalar_lea.vmem %s19_s19, 8192  ;;  %p1147_p4 = scmp.lt.s32.totalorder %s19_s19, %s19_s19 }
   0x8   :  { %p1143_p3 = scmp.ne.s32.totalorder %s19_s19, %s1142_s27  ;;  %p1148_p5 = scmp.lt.s32.totalorder %s1142_s27, %s1142_s27 }
   0xa   :  { %p1149_p6 = por %p1148_p5, %p1147_p4 }
   0xc   :  { %p1150_p7 = pnand %p1149_p6, %p1143_p3 }
   0xe   :  { %1153 = shalt.err (!%p1150_p7)
}
   0xf   :  { %s1157_s28 = smov 64   ;;  %s1158_s29 = smov 4  }
  0x10   :  { %24 = dma.hbm_to_vmem [thread:$0]  %s1288_s1, 8192, %s19_s19, [#allocation3], %s1157_s28, %s1157_s28, %s1158_s29  }
  0x11   :  { %1154 = dma.done.wait [#allocation3], 8192  }
  0x12   :  { %1155 = vsyncadd [#allocation3], 4294959104  ;;  %v1060_v0 = vld [vmem:[#allocation2 + $0x40] sm:$0xff]   ;;  %v1064_v4 = vld [vmem:[#allocation2 + $0x48] sm:$0xff]   ;;  %vm1160_vm0 = vmmov 0  }
  0x13   :  { %v1061_v1 = vld [vmem:[#allocation2 + $0xc0] sm:$0xff]   ;;  %938 = vmatprep.subr.bf16.mxu0 %v1060_v0  ;;  %v1065_v5 = vld [vmem:[#allocation2 + $0xc8] sm:$0xff]   ;;  %v1068_v8 = vld [vmem:[#allocation2 + $0x50] sm:$0xff]  }
  0x14   :  { %v1062_v2 = vld [vmem:[#allocation2] sm:$0xff]   ;;  %960 = vmatprep.subr.bf16.mxu1 %v1061_v1  ;;  %v1066_v6 = vld [vmem:[#allocation2 + $0x8] sm:$0xff]   ;;  %v1069_v9 = vld [vmem:[#allocation2 + $0xd0] sm:$0xff]  }
  0x15   :  { %v1063_v3 = vld [vmem:[#allocation2 + $0x80] sm:$0xff]   ;;  %939 = vmatpush3.bf16.msra.mxu0 %v1062_v2  ;;  %v1067_v7 = vld [vmem:[#allocation2 + $0x88] sm:$0xff]   ;;  %v1070_v10 = vld [vmem:[#allocation2 + $0x10] sm:$0xff]  }
  0x16   :  { %961 = vmatpush3.bf16.msra.mxu1 %v1063_v3  ;;  %940 = vmatprep.subr.bf16.mxu0 %v1064_v4  ;;  %v1071_v11 = vld [vmem:[#allocation2 + $0x90] sm:$0xff]   ;;  %v1072_v12 = vld [vmem:[#allocation2 + $0x58] sm:$0xff]   ;;  %v1076_v16 = vld [vmem:[#allocation2 + $0x60] sm:$0xff]  }
  0x17   :  { %962 = vmatprep.subr.bf16.mxu1 %v1065_v5  ;;  %v1073_v13 = vld [vmem:[#allocation2 + $0xd8] sm:$0xff]   ;;  %v1077_v17 = vld [vmem:[#allocation2 + $0xe0] sm:$0xff]   ;;  %v1080_v20 = vld [vmem:[#allocation2 + $0x68] sm:$0xff]  }
  0x18   :  { %v1074_v14 = vld [vmem:[#allocation2 + $0x18] sm:$0xff]   ;;  %v1078_v18 = vld [vmem:[#allocation2 + $0x20] sm:$0xff]   ;;  %v1081_v21 = vld [vmem:[#allocation2 + $0xe8] sm:$0xff]  }
  0x19   :  { %941 = vmatpush3.bf16.msra.mxu0 %v1066_v6  ;;  %v1075_v15 = vld [vmem:[#allocation2 + $0x98] sm:$0xff]   ;;  %v1079_v19 = vld [vmem:[#allocation2 + $0xa0] sm:$0xff]   ;;  %v1082_v22 = vld [vmem:[#allocation2 + $0x28] sm:$0xff]  }
  0x1a   :  { %963 = vmatpush3.bf16.msra.mxu1 %v1067_v7  ;;  %942 = vmatprep.subr.bf16.mxu0 %v1068_v8  ;;  %v1083_v23 = vld [vmem:[#allocation2 + $0xa8] sm:$0xff]   ;;  %v1084_v24 = vld [vmem:[#allocation2 + $0x70] sm:$0xff]   ;;  %v1088_v28 = vld [vmem:[#allocation2 + $0x78] sm:$0xff]  }
  0x1b   :  { %964 = vmatprep.subr.bf16.mxu1 %v1069_v9  ;;  %v1085_v25 = vld [vmem:[#allocation2 + $0xf0] sm:$0xff]   ;;  %v1089_v29 = vld [vmem:[#allocation2 + $0xf8] sm:$0xff]   ;;  %v36_v32 = vld [vmem:[%s1287_s0 + $0x8] sm:$0xff] }
  0x1c   :  { %v1086_v26 = vld [vmem:[#allocation2 + $0x30] sm:$0xff]   ;;  %v1090_v30 = vld [vmem:[#allocation2 + $0x38] sm:$0xff]   ;;  %v44_v33 = vld [vmem:[%s1287_s0 + $0x48] sm:$0xff] }
  0x1d   :  { %943 = vmatpush3.bf16.msra.mxu0 %v1070_v10  ;;  %v1087_v27 = vld [vmem:[#allocation2 + $0xb0] sm:$0xff]   ;;  %v1091_v31 = vld [vmem:[#allocation2 + $0xb8] sm:$0xff]   ;;  %v52_v35 = vpack.c.bf16 %v44_v33, %v36_v32  ;;  %v35_v37 = vld [vmem:[%s1287_s0] sm:$0xff] }
  0x1e   :  { %965 = vmatpush3.bf16.msra.mxu1 %v1071_v11  ;;  %944 = vmatprep.subr.bf16.mxu0 %v1072_v12  ;;  %v38_v34 = vld [vmem:[%s1287_s0 + $0x18] sm:$0xff]  ;;  %v43_v38 = vld [vmem:[%s1287_s0 + $0x40] sm:$0xff]  ;;  %v37_v41 = vld [vmem:[%s1287_s0 + $0x10] sm:$0xff] }
  0x1f   :  { %966 = vmatprep.subr.bf16.mxu1 %v1073_v13  ;;  %v46_v36 = vld [vmem:[%s1287_s0 + $0x58] sm:$0xff]  ;;  %v51_v40 = vpack.c.bf16 %v43_v38, %v35_v37  ;;  %v45_v42 = vld [vmem:[%s1287_s0 + $0x50] sm:$0xff]  ;;  %610 = vmatprep.mubr.bf16.mxu0 %v52_v35  ;;  %v1092_v44 = vld [vmem:[#allocation2 + $0x140] sm:$0xff]  }
  0x20   :  { %v54_v39 = vpack.c.bf16 %v46_v36, %v38_v34  ;;  %v53_v43 = vpack.c.bf16 %v45_v42, %v37_v41  ;;  %v1093_v45 = vld [vmem:[#allocation2 + $0x1c0] sm:$0xff]   ;;  %v1096_v48 = vld [vmem:[#allocation2 + $0x148] sm:$0xff]   ;;  %v1100_v52 = vld [vmem:[#allocation2 + $0x150] sm:$0xff]  }
  0x21   :  { %945 = vmatpush3.bf16.msra.mxu0 %v1074_v14  ;;  %v1094_v46 = vld [vmem:[#allocation2 + $0x100] sm:$0xff]   ;;  %v1097_v49 = vld [vmem:[#allocation2 + $0x1c8] sm:$0xff]   ;;  %v1101_v53 = vld [vmem:[#allocation2 + $0x1d0] sm:$0xff]  }
  0x22   :  { %967 = vmatpush3.bf16.msra.mxu1 %v1075_v15  ;;  %946 = vmatprep.subr.bf16.mxu0 %v1076_v16  ;;  %v1095_v47 = vld [vmem:[#allocation2 + $0x180] sm:$0xff]   ;;  %v1098_v50 = vld [vmem:[#allocation2 + $0x108] sm:$0xff]   ;;  %v1102_v54 = vld [vmem:[#allocation2 + $0x110] sm:$0xff]  }
  0x23   :  { %968 = vmatprep.subr.bf16.mxu1 %v1077_v17  ;;  %651 = vmatprep.mubr.bf16.mxu1 %v54_v39  ;;  %v1099_v51 = vld [vmem:[#allocation2 + $0x188] sm:$0xff]   ;;  %v1103_v55 = vld [vmem:[#allocation2 + $0x190] sm:$0xff]   ;;  %v1104_v56 = vld [vmem:[#allocation2 + $0x158] sm:$0xff]  }
  0x24   :  { %v1105_v57 = vld [vmem:[#allocation2 + $0x1d8] sm:$0xff]   ;;  %v1108_v60 = vld [vmem:[#allocation2 + $0x160] sm:$0xff]   ;;  %v1112_v0 = vld [vmem:[#allocation2 + $0x168] sm:$0xff]  }
  0x25   :  { %947 = vmatpush3.bf16.msra.mxu0 %v1078_v18  ;;  %v1106_v58 = vld [vmem:[#allocation2 + $0x118] sm:$0xff]   ;;  %v1109_v61 = vld [vmem:[#allocation2 + $0x1e0] sm:$0xff]   ;;  %v1113_v1 = vld [vmem:[#allocation2 + $0x1e8] sm:$0xff]  }
  0x26   :  { %969 = vmatpush3.bf16.msra.mxu1 %v1079_v19  ;;  %948 = vmatprep.subr.bf16.mxu0 %v1080_v20  ;;  %v1107_v59 = vld [vmem:[#allocation2 + $0x198] sm:$0xff]   ;;  %v1110_v62 = vld [vmem:[#allocation2 + $0x120] sm:$0xff]   ;;  %v1114_v2 = vld [vmem:[#allocation2 + $0x128] sm:$0xff]  }
  0x27   :  { %970 = vmatprep.subr.bf16.mxu1 %v1081_v21  ;;  %v1111_v63 = vld [vmem:[#allocation2 + $0x1a0] sm:$0xff]   ;;  %v1115_v3 = vld [vmem:[#allocation2 + $0x1a8] sm:$0xff]   ;;  %v1116_v4 = vld [vmem:[#allocation2 + $0x170] sm:$0xff]  }
  0x28   :  { %v1117_v5 = vld [vmem:[#allocation2 + $0x1f0] sm:$0xff]   ;;  %v1120_v8 = vld [vmem:[#allocation2 + $0x178] sm:$0xff]   ;;  %v40_v12 = vld [vmem:[%s1287_s0 + $0x28] sm:$0xff] }
  0x29   :  { %949 = vmatpush3.bf16.msra.mxu0 %v1082_v22  ;;  %v1118_v6 = vld [vmem:[#allocation2 + $0x130] sm:$0xff]   ;;  %v1121_v9 = vld [vmem:[#allocation2 + $0x1f8] sm:$0xff]   ;;  %v48_v13 = vld [vmem:[%s1287_s0 + $0x68] sm:$0xff] }
  0x2a   :  { %971 = vmatpush3.bf16.msra.mxu1 %v1083_v23  ;;  %950 = vmatprep.subr.bf16.mxu0 %v1084_v24  ;;  %v1119_v7 = vld [vmem:[#allocation2 + $0x1b0] sm:$0xff]   ;;  %v1122_v10 = vld [vmem:[#allocation2 + $0x138] sm:$0xff]   ;;  %v56_v16 = vpack.c.bf16 %v48_v13, %v40_v12  ;;  %v39_v18 = vld [vmem:[%s1287_s0 + $0x20] sm:$0xff] }
  0x2b   :  { %972 = vmatprep.subr.bf16.mxu1 %v1085_v25  ;;  %v1123_v11 = vld [vmem:[#allocation2 + $0x1b8] sm:$0xff]   ;;  %v47_v19 = vld [vmem:[%s1287_s0 + $0x60] sm:$0xff]  ;;  %v41_v20 = vld [vmem:[%s1287_s0 + $0x30] sm:$0xff]  ;;  %v1159_v25 = vmov 0.0  }
  0x2c   :  { %v42_v14 = vld [vmem:[%s1287_s0 + $0x38] sm:$0xff]  ;;  %v55_v21 = vpack.c.bf16 %v47_v19, %v39_v18  ;;  %v49_v22 = vld [vmem:[%s1287_s0 + $0x70] sm:$0xff]  ;;  %v1124_v24 = vld [vmem:[%s1290_s3] sm:$0xff]  }
  0x2d   :  { %951 = vmatpush3.bf16.msra.mxu0 %v1086_v26  ;;  %v50_v15 = vld [vmem:[%s1287_s0 + $0x78] sm:$0xff]  ;;  %v57_v23 = vpack.c.bf16 %v49_v22, %v41_v20  ;;  %v1125_v26 = vld [vmem:[%s1290_s3 + $0x8] sm:$0xff]   ;;  %v864_v35 = vld [vmem:[%s1289_s2] ss:$0 sm:$0xff] }
  0x2e   :  { %973 = vmatpush3.bf16.msra.mxu1 %v1087_v27  ;;  %952 = vmatprep.subr.bf16.mxu0 %v1088_v28  ;;  %v58_v17 = vpack.c.bf16 %v50_v15, %v42_v14  ;;  %v1126_v27 = vld [vmem:[%s1290_s3 + $0x10] sm:$0xff]   ;;  %v1127_v28 = vld [vmem:[%s1290_s3 + $0x18] sm:$0xff]  }
  0x2f   :  { %974 = vmatprep.subr.bf16.mxu1 %v1089_v29  ;;  %v1128_v29 = vld [vmem:[%s1290_s3 + $0x20] sm:$0xff]   ;;  %v1131_v32 = vld [vmem:[%s1290_s3 + $0x38] sm:$0xff]  }
  0x31   :  { %953 = vmatpush3.bf16.msra.mxu0 %v1090_v30  ;;  %v1129_v30 = vld [vmem:[%s1290_s3 + $0x28] sm:$0xff]  }
  0x32   :  { %975 = vmatpush3.bf16.msra.mxu1 %v1091_v31  ;;  %982 = vmatprep.subr.bf16.mxu0 %v1092_v44  ;;  %v1130_v31 = vld [vmem:[%s1290_s3 + $0x30] sm:$0xff]  }
  0x33   :  { %1004 = vmatprep.subr.bf16.mxu1 %v1093_v45 }
  0x34   :  { %611 = vmatmul.mubr.bf16.vlgmr.msra.gmra.mrb[0].mxu0 %v51_v40 }
  0x35   :  { %652 = vmatmul.mubr.bf16.vlgmr.msra.gmra.mrb[0].mxu1 %v53_v43  ;;  %983 = vmatpush3.bf16.msra.mxu0 %v1094_v46 }
  0x36   :  { %1005 = vmatpush3.bf16.msra.mxu1 %v1095_v47  ;;  %984 = vmatprep.subr.bf16.mxu0 %v1096_v48 }
  0x37   :  { %1006 = vmatprep.subr.bf16.mxu1 %v1097_v49  ;;  %692 = vmatprep.mubr.bf16.mxu0 %v56_v16 }
  0x38   :  { %733 = vmatprep.mubr.bf16.mxu1 %v58_v17 }
  0x39   :  { %985 = vmatpush3.bf16.msra.mxu0 %v1098_v50 }
  0x3a   :  { %1007 = vmatpush3.bf16.msra.mxu1 %v1099_v51  ;;  %986 = vmatprep.subr.bf16.mxu0 %v1100_v52 }
  0x3b   :  { %1008 = vmatprep.subr.bf16.mxu1 %v1101_v53 }
  0x3d   :  { %987 = vmatpush3.bf16.msra.mxu0 %v1102_v54 }
  0x3e   :  { %1009 = vmatpush3.bf16.msra.mxu1 %v1103_v55  ;;  %988 = vmatprep.subr.bf16.mxu0 %v1104_v56 }
  0x3f   :  { %1010 = vmatprep.subr.bf16.mxu1 %v1105_v57 }
  0x41   :  { %989 = vmatpush3.bf16.msra.mxu0 %v1106_v58 }
  0x42   :  { %1011 = vmatpush3.bf16.msra.mxu1 %v1107_v59  ;;  %990 = vmatprep.subr.bf16.mxu0 %v1108_v60 }
  0x43   :  { %1012 = vmatprep.subr.bf16.mxu1 %v1109_v61 }
  0x45   :  { %991 = vmatpush3.bf16.msra.mxu0 %v1110_v62 }
  0x46   :  { %1013 = vmatpush3.bf16.msra.mxu1 %v1111_v63  ;;  %992 = vmatprep.subr.bf16.mxu0 %v1112_v0 }
  0x47   :  { %1014 = vmatprep.subr.bf16.mxu1 %v1113_v1 }
  0x49   :  { %993 = vmatpush3.bf16.msra.mxu0 %v1114_v2 }
  0x4a   :  { %1015 = vmatpush3.bf16.msra.mxu1 %v1115_v3  ;;  %994 = vmatprep.subr.bf16.mxu0 %v1116_v4 }
  0x4b   :  { %1016 = vmatprep.subr.bf16.mxu1 %v1117_v5  ;;  %v929_v5 = vld [vmem:[%s1291_s4] ss:$0 sm:$0xff] }
  0x4d   :  { %995 = vmatpush3.bf16.msra.mxu0 %v1118_v6 }
  0x4e   :  { %1017 = vmatpush3.bf16.msra.mxu1 %v1119_v7  ;;  %996 = vmatprep.subr.bf16.mxu0 %v1120_v8 }
  0x4f   :  { %1018 = vmatprep.subr.bf16.mxu1 %v1121_v9 }
  0x51   :  { %997 = vmatpush3.bf16.msra.mxu0 %v1122_v10 }
  0x52   :  { %1019 = vmatpush3.bf16.msra.mxu1 %v1123_v11  ;;  %1035 = vmatprep.subr.bf16.mxu0 %v1159_v25 }
  0x54   :  { %693 = vmatmul.mubr.bf16.vlgmr.msra.gmra.mrb[4].mxu0 %v55_v21 }
  0x55   :  { %734 = vmatmul.mubr.bf16.vlgmr.msra.gmra.mrb[4].mxu1 %v57_v23  ;;  %1036 = vmatpush3.bf16.msra.mxu0 %v1124_v24 }
  0x56   :  { %1037 = vmatprep.subr.bf16.mxu0 %v1159_v25  ;;  %1051 = vmatprep.mubr.msk.bf16.mxu0 %vm1160_vm0, %v1159_v25 }
  0x59   :  { %1038 = vmatpush3.bf16.msra.mxu0 %v1125_v26 }
  0x5a   :  { %1039 = vmatprep.subr.bf16.mxu0 %v1159_v25 }
  0x5d   :  { %1040 = vmatpush3.bf16.msra.mxu0 %v1126_v27 }
  0x5e   :  { %1041 = vmatprep.subr.bf16.mxu0 %v1159_v25 }
  0x61   :  { %1042 = vmatpush3.bf16.msra.mxu0 %v1127_v28 }
  0x62   :  { %1043 = vmatprep.subr.bf16.mxu0 %v1159_v25 }
  0x65   :  { %1044 = vmatpush3.bf16.msra.mxu0 %v1128_v29 }
  0x66   :  { %1045 = vmatprep.subr.bf16.mxu0 %v1159_v25 }
  0x69   :  { %1046 = vmatpush3.bf16.msra.mxu0 %v1129_v30 }
  0x6a   :  { %1047 = vmatprep.subr.bf16.mxu0 %v1159_v25 }
  0x6d   :  { %1048 = vmatpush3.bf16.msra.mxu0 %v1130_v31 }
  0x6e   :  { %1049 = vmatprep.subr.bf16.mxu0 %v1159_v25 }
  0x71   :  { %1050 = vmatpush3.bf16.msra.mxu0 %v1131_v32 }
 0x107   :  { %v954_v33 = vpop.f32.mrb[0].mxu0 }
 0x108   :  { %v976_v34 = vpop.f32.mrb[0].mxu1  ;;  %v955_v36 = vpop.f32.mrb[1].mxu0 }
 0x109   :  { %v956_v37 = vadd.f32 %v955_v36, %v954_v33  ;;  %v977_v38 = vpop.f32.mrb[1].mxu1  ;;  %v957_v39 = vpop.f32.mrb[2].mxu0 }
 0x10a   :  { %v978_v40 = vadd.f32 %v977_v38, %v976_v34  ;;  %v979_v41 = vpop.f32.mrb[2].mxu1  ;;  %v958_v42 = vpop.f32.mrb[3].mxu0 }
 0x10b   :  { %v613_v43 = vadd.f32 %v956_v37, %v864_v35  ;;  %v959_v44 = vadd.f32 %v958_v42, %v957_v39  ;;  %v980_v45 = vpop.f32.mrb[3].mxu1 }
 0x10c   :  { %v981_v46 = vadd.f32 %v980_v45, %v979_v41 }
 0x10d   :  { %v654_v47 = vadd.f32 %v978_v40, %v613_v43  ;;  %v616_v48 = vadd.f32 %v959_v44, %v864_v35 }
 0x10f   :  { %v657_v49 = vadd.f32 %v981_v46, %v616_v48 }
 0x127   :  { %v998_v50 = vpop.f32.mrb[4].mxu0 }
 0x128   :  { %v1020_v51 = vpop.f32.mrb[4].mxu1  ;;  %v999_v52 = vpop.f32.mrb[5].mxu0 }
 0x129   :  { %v1000_v53 = vadd.f32 %v999_v52, %v998_v50  ;;  %v1021_v54 = vpop.f32.mrb[5].mxu1  ;;  %v1001_v55 = vpop.f32.mrb[6].mxu0 }
 0x12a   :  { %v1022_v56 = vadd.f32 %v1021_v54, %v1020_v51  ;;  %v1023_v57 = vpop.f32.mrb[6].mxu1  ;;  %v1002_v58 = vpop.f32.mrb[7].mxu0 }
 0x12b   :  { %v695_v59 = vadd.f32 %v1000_v53, %v654_v47  ;;  %v1003_v60 = vadd.f32 %v1002_v58, %v1001_v55  ;;  %v1024_v61 = vpop.f32.mrb[7].mxu1 }
 0x12c   :  { %v1025_v62 = vadd.f32 %v1024_v61, %v1023_v57 }
 0x12d   :  { %v736_v63 = vadd.f32 %v1022_v56, %v695_v59  ;;  %v698_v0 = vadd.f32 %v1003_v60, %v657_v49 }
 0x12f   :  { %v739_v1 = vadd.f32 %v1025_v62, %v698_v0  ;;  %v742_v2 = vmax.f32 %v736_v63, 0.0 }
 0x131   :  { %v743_v3 = vmax.f32 %v739_v1, 0.0 }
 0x133   :  { %v744_v4 = vpack.c.bf16 %v743_v3, %v742_v2 }
 0x135   :  { %1052 = vmatmul.mubr.bf16.vlgmr.msra.gmra.mrb[8].mxu0 %v744_v4 }
 0x208   :  { %v850_v6 = vpop.f32.mrb[8].mxu0 }
 0x209   :  { %v851_v7 = vadd.f32 %v929_v5, %v850_v6  ;;  %v1053_v8 = vpop.f32.mrb[9].mxu0 }
 0x20a   :  { %v853_v9 = vpop.f32.mrb[10].mxu0 }
 0x20b   :  { %857 = vst [vmem:[%s1292_s5] sm:$0xff] %v851_v7  ;;  %v854_v10 = vadd.f32 %v929_v5, %v853_v9  ;;  %v1054_v11 = vpop.f32.mrb[11].mxu0 }
 0x20d   :  { %858 = vst [vmem:[%s1292_s5 + $0x8] sm:$0xff] %v854_v10 }
 0x20e   :  { %863 = vsyncpa [#allocation3], 1 }

</bundles_post_ra>
